<compile_context>
chip_gen: v7x
topology: tpu7x:2x2x1
jax: 0.10.0
libtpu: 0.0.40
codegen_flags: <defaults>
</compile_context>

<pallas_src>
import jax
import jax.numpy as jnp
from jax import lax
from jax.experimental import pallas as pl
from jax.experimental.pallas import tpu as pltpu

EPS = 1e-5


def _round_up(x, m):
    return (x + m - 1) // m * m


def _layout_bytes(shape, itemsize=4):
    """VMEM footprint of an f32 buffer after (8, 128) layout rounding."""
    s = list(shape)
    if len(s) == 1:
        s = [1] + s
    s[-1] = _round_up(s[-1], 128)
    s[-2] = _round_up(s[-2], 8)
    n = 1
    for d in s:
        n *= d
    return n * itemsize


def cbr2d_forward(x, conv_w, conv_b, bn_gamma, bn_beta,
                  kernel_size=3, padding=1):
    """x: (N, Cin, H, W) f32; conv_w: (Cout, Cin, 3, 3). Returns (N, Cout, H, W)."""
    # The conv bias is accepted for interface fidelity but never used: a
    # per-channel constant added before training-mode BatchNorm is cancelled
    # exactly by the batch-mean subtraction, so the output is unchanged.
    del conv_b
    assert kernel_size == 3 and padding == 1, "kernel specialised for 3x3, pad=1"

    N, Cin, H, W = x.shape
    Cout = conv_w.shape[0]
    HW = H * W
    M = N * HW
    Cin_p = _round_up(Cin, 8)          # sublane-aligned input channels
    Cout_p = _round_up(Cout, 8)        # sublane-aligned output channels
    XLEN = (H + 2) * W + 2             # H-padded rows flattened, +1 zero elem/side

    # Megacore split for pass 1 (v7x has 2 TensorCores; serialized elsewhere).
    NC = 2 if (N % 2 == 0 and N >= 2) else 1
    NT = N // NC

    # ---- wrapper-side prep: one cheap zero-pad + free reshapes (no im2col) ----
    x_h = jnp.pad(x, ((0, 0), (0, Cin_p - Cin), (1, 1), (0, 0)))   # (N,Cin_p,H+2,W)
    x_flat = jnp.pad(x_h.reshape(N, Cin_p, (H + 2) * W),
                     ((0, 0), (0, 0), (1, 1)))                      # (N,Cin_p,XLEN)

    # Weights as 9 taps of (Cout_p, Cin_p); w_taps[dh*3+dw] == conv_w[:, :, dh, dw].
    w_taps = jnp.transpose(conv_w, (2, 3, 0, 1)).reshape(9, Cout, Cin)
    w_taps = jnp.pad(w_taps, ((0, 0), (0, Cout_p - Cout), (0, Cin_p - Cin)))

    # ---------------- pass 1: conv (9 shifted matmuls) + channel stats ----------
    def conv_stats_kernel(x_ref, w_ref, y_ref, sum_ref, ssq_ref):
        xt = x_ref[0]                                          # (Cin_p, XLEN)
        col = lax.broadcasted_iota(jnp.int32, (Cout_p, HW), 1) % W
        acc = jnp.zeros((Cout_p, HW), jnp.float32)
        for dw in range(3):                    # static unroll: 9 shifted matmuls
            part = jnp.zeros((Cout_p, HW), jnp.float32)
            for dh in range(3):
                off = dh * W + dw              # static flat offset into padded rows
                part = part + jnp.dot(w_ref[dh * 3 + dw], xt[:, off:off + HW],
                                      preferred_element_type=jnp.float32)
            if dw == 0:        # left neighbour does not exist at w == 0
                part = jnp.where(col == 0, 0.0, part)
            elif dw == 2:      # right neighbour does not exist at w == W-1
                part = jnp.where(col == W - 1, 0.0, part)
            acc = acc + part
        y_ref[0] = acc                                         # (Cout_p, HW)

        @pl.when(pl.program_id(1) == 0)        # first image handled by this core
        def _():
            sum_ref[...] = jnp.zeros_like(sum_ref)
            ssq_ref[...] = jnp.zeros_like(ssq_ref)

        # Per-core channel statistics (lane reductions; reduced across cores in
        # the wrapper).  Note E[x^2]-E[x]^2 fold; fine at these magnitudes/M.
        sum_ref[0] = sum_ref[0] + jnp.sum(acc, axis=1, keepdims=True)
        ssq_ref[0] = ssq_ref[0] + jnp.sum(acc * acc, axis=1, keepdims=True)

    # ---------------- pass 2: fused BN scale/shift + ReLU, NCHW write -----------
    def bn_relu_kernel(y_ref, scale_ref, shift_ref, o_ref):
        yt = y_ref[0, :Cout, :]                                # (Cout, HW)
        o_ref[0] = jnp.maximum(yt * scale_ref[...] + shift_ref[...], 0.0)

    # ---------------- VMEM budget (layout-rounded, generation aware) ------------
    p1 = (2 * _layout_bytes((1, Cin_p, XLEN))
          + 2 * _layout_bytes((9, Cout_p, Cin_p))
          + 2 * _layout_bytes((1, Cout_p, HW))
          + 4 * _layout_bytes((1, Cout_p, 1))
          + 8 * _layout_bytes((Cout_p, HW)))                   # in-kernel temps
    p2 = (2 * _layout_bytes((1, Cout_p, HW))
          + 2 * _layout_bytes((1, Cout, HW))
          + 4 * _layout_bytes((Cout, 1))
          + 4 * _layout_bytes((Cout, HW)))
    try:
        vmem_cap = int(pltpu.get_tpu_info().vmem_capacity_bytes)
    except Exception:
        vmem_cap = 64 << 20                                    # v7x per-TC floor
    vmem_limit = int(min(max(2 * max(p1, p2), 16 << 20), (vmem_cap * 3) // 4))

    y, c_sum, c_ssq = pl.pallas_call(
        conv_stats_kernel,
        out_shape=(jax.ShapeDtypeStruct((N, Cout_p, HW), jnp.float32),
                   jax.ShapeDtypeStruct((NC, Cout_p, 1), jnp.float32),
                   jax.ShapeDtypeStruct((NC, Cout_p, 1), jnp.float32)),
        grid=(NC, NT),
        in_specs=[pl.BlockSpec((1, Cin_p, XLEN), lambda c, t: (c * NT + t, 0, 0)),
                  pl.BlockSpec((9, Cout_p, Cin_p), lambda c, t: (0, 0, 0))],
        out_specs=(pl.BlockSpec((1, Cout_p, HW), lambda c, t: (c * NT + t, 0, 0)),
                   pl.BlockSpec((1, Cout_p, 1), lambda c, t: (c, 0, 0)),
                   pl.BlockSpec((1, Cout_p, 1), lambda c, t: (c, 0, 0))),
        compiler_params=pltpu.CompilerParams(
            dimension_semantics=("parallel", "arbitrary"),
            vmem_limit_bytes=vmem_limit),
    )(x_flat, w_taps)

    # ---- fold training-mode BatchNorm into one per-channel scale / shift -------
    csum = jnp.sum(c_sum, axis=0)[:Cout, 0]
    cssq = jnp.sum(c_ssq, axis=0)[:Cout, 0]
    mean = csum / M
    var = jnp.maximum(cssq / M - mean * mean, 0.0)     # biased batch variance
    scale_v = bn_gamma * lax.rsqrt(var + EPS)
    shift_v = bn_beta - mean * scale_v
    scale = scale_v.reshape(Cout, 1)
    shift = shift_v.reshape(Cout, 1)

    out = pl.pallas_call(
        bn_relu_kernel,
        out_shape=jax.ShapeDtypeStruct((N, Cout, HW), jnp.float32),
        grid=(N,),
        in_specs=[pl.BlockSpec((1, Cout_p, HW), lambda n: (n, 0, 0)),
                  pl.BlockSpec((Cout, 1), lambda n: (0, 0)),
                  pl.BlockSpec((Cout, 1), lambda n: (0, 0))],
        out_specs=pl.BlockSpec((1, Cout, HW), lambda n: (n, 0, 0)),
        compiler_params=pltpu.CompilerParams(
            dimension_semantics=("parallel",),
            vmem_limit_bytes=vmem_limit),
    )(y, scale, shift)

    return out.reshape(N, Cout, H, W)


def _reference(x, conv_w, conv_b, bn_gamma, bn_beta):
    y = lax.conv_general_dilated(
        x, conv_w, window_strides=(1, 1), padding=((1, 1), (1, 1)),
        dimension_numbers=("NCHW", "OIHW", "NCHW"))
    y = y + conv_b[None, :, None, None]
    mean = jnp.mean(y, axis=(0, 2, 3), keepdims=True)
    var = jnp.mean((y - mean) ** 2, axis=(0, 2, 3), keepdims=True)
    y = (y - mean) / jnp.sqrt(var + EPS)
    y = y * bn_gamma[None, :, None, None] + bn_beta[None, :, None, None]
    return jnp.maximum(y, 0.0)


if __name__ == "__main__":
    key = jax.random.PRNGKey(0)
    N, Cin, H, W = 2, 4, 16, 16
    Cout, ksz = 8, 3

    k_x, k_w, k_b = jax.random.split(key, 3)
    x = jax.random.normal(k_x, (N, Cin, H, W), dtype=jnp.float32)

    # Deterministic parameter init (synthetic weights, PyTorch-like fan-in scale)
    fan_in = Cin * ksz * ksz
    bound = 1.0 / (fan_in ** 0.5)
    conv_w = jax.random.uniform(k_w, (Cout, Cin, ksz, ksz),
                                minval=-bound, maxval=bound, dtype=jnp.float32)
    conv_b = jax.random.uniform(k_b, (Cout,), minval=-bound, maxval=bound,
                                dtype=jnp.float32)
    bn_gamma = jnp.ones((Cout,), dtype=jnp.float32)   # BatchNorm2d default init
    bn_beta = jnp.zeros((Cout,), dtype=jnp.float32)

    out = cbr2d_forward(x, conv_w, conv_b, bn_gamma, bn_beta)
    out = jax.block_until_ready(out)

    ref = _reference(x, conv_w, conv_b, bn_gamma, bn_beta)
    assert out.shape == (N, Cout, H, W)
    assert jnp.allclose(out, ref, atol=1e-4, rtol=1e-4), \
        f"max abs err {jnp.max(jnp.abs(out - ref))}"

    print("KERNEL_OK")
</pallas_src>

<mosaic_0001>
module attributes {stable_mosaic.version = 11 : i64} {
  func.func @conv_stats_kernel(%arg0: i32, %arg1: i32, %arg2: memref<1x8x290xf32, #tpu.memory_space<vmem>>, %arg3: memref<9x8x8xf32, #tpu.memory_space<vmem>>, %arg4: memref<1x8x256xf32, #tpu.memory_space<vmem>>, %arg5: memref<1x8x1xf32, #tpu.memory_space<vmem>>, %arg6: memref<1x8x1xf32, #tpu.memory_space<vmem>>) attributes {dimension_semantics = [#tpu.dimension_semantics<parallel>, #tpu.dimension_semantics<arbitrary>], iteration_bounds = array<i64: 2, 1>, scalar_prefetch = 0 : i64, scratch_operands = 0 : i64, tpu.core_type = #tpu.core_type<tc>, window_params = [{transform_indices = @transform_0, window_bounds = array<i64: 1, 8, 290>}, {pipeline_mode = #tpu.pipeline_mode<synchronous>, transform_indices = @transform_1, window_bounds = array<i64: 9, 8, 8>}, {transform_indices = @transform_2, window_bounds = array<i64: 1, 8, 256>}, {transform_indices = @transform_3, window_bounds = array<i64: 1, 8, 1>}, {transform_indices = @transform_4, window_bounds = array<i64: 1, 8, 1>}]} {
    %c0 = arith.constant 0 : index
    %c0_0 = arith.constant 0 : index
    %c0_1 = arith.constant 0 : index
    %0 = vector.load %arg2[%c0, %c0_0, %c0_1] : memref<1x8x290xf32, #tpu.memory_space<vmem>>, vector<1x8x290xf32>
    %1 = vector.shape_cast %0 : vector<1x8x290xf32> to vector<8x290xf32>
    %2 = tpu.iota {dimensions = array<i32: 1>} : vector<8x256xi32>
    %c16_i32 = arith.constant 16 : i32
    %c0_i32 = arith.constant 0 : i32
    %3 = arith.cmpi eq, %c16_i32, %c0_i32 : i32
    %c1_i32 = arith.constant 1 : i32
    %4 = arith.select %3, %c1_i32, %c16_i32 : i32
    %5 = vector.broadcast %4 : i32 to vector<8x256xi32>
    %6 = arith.remsi %2, %5 : vector<8x256xi32>
    %c0_i32_2 = arith.constant 0 : i32
    %7 = vector.broadcast %c0_i32_2 : i32 to vector<8x256xi32>
    %8 = arith.cmpi ne, %6, %7 : vector<8x256xi32>
    %c0_i32_3 = arith.constant 0 : i32
    %9 = vector.broadcast %c0_i32_3 : i32 to vector<8x256xi32>
    %10 = arith.cmpi slt, %6, %9 : vector<8x256xi32>
    %c0_i32_4 = arith.constant 0 : i32
    %11 = arith.cmpi slt, %4, %c0_i32_4 : i32
    %12 = vector.broadcast %11 : i1 to vector<8x256xi1>
    %13 = vector.broadcast %12 : vector<8x256xi1> to vector<8x256xi1>
    %14 = arith.xori %10, %13 : vector<8x256xi1>
    %15 = arith.andi %14, %8 : vector<8x256xi1>
    %16 = vector.broadcast %4 : i32 to vector<8x256xi32>
    %17 = arith.addi %6, %16 : vector<8x256xi32>
    %18 = arith.select %15, %17, %6 : vector<8x256xi1>, vector<8x256xi32>
    %cst = arith.constant 0.000000e+00 : f32
    %19 = vector.broadcast %cst : f32 to vector<8x256xf32>
    %cst_5 = arith.constant 0.000000e+00 : f32
    %20 = vector.broadcast %cst_5 : f32 to vector<8x256xf32>
    %c0_6 = arith.constant 0 : index
    %c0_7 = arith.constant 0 : index
    %c0_8 = arith.constant 0 : index
    %21 = vector.load %arg3[%c0_6, %c0_7, %c0_8] : memref<9x8x8xf32, #tpu.memory_space<vmem>>, vector<1x8x8xf32>
    %22 = vector.shape_cast %21 : vector<1x8x8xf32> to vector<8x8xf32>
    %23 = vector.extract_strided_slice %1 {offsets = [0, 0], sizes = [8, 256], strides = [1, 1]} : vector<8x290xf32> to vector<8x256xf32>
    %cst_9 = arith.constant dense<0.000000e+00> : vector<8x256xf32>
    %24 = tpu.matmul %22, %23, %cst_9 {dimension_numbers = #tpu.dot_dimension_numbers<[1], [0], [0], [1], [0, 0, 1, 1], [], []>} : vector<8x8xf32>, vector<8x256xf32>, vector<8x256xf32> -> vector<8x256xf32>
    %25 = arith.addf %20, %24 : vector<8x256xf32>
    %c3 = arith.constant 3 : index
    %c0_10 = arith.constant 0 : index
    %c0_11 = arith.constant 0 : index
    %26 = vector.load %arg3[%c3, %c0_10, %c0_11] : memref<9x8x8xf32, #tpu.memory_space<vmem>>, vector<1x8x8xf32>
    %27 = vector.shape_cast %26 : vector<1x8x8xf32> to vector<8x8xf32>
    %28 = vector.extract_strided_slice %1 {offsets = [0, 16], sizes = [8, 256], strides = [1, 1]} : vector<8x290xf32> to vector<8x256xf32>
    %cst_12 = arith.constant dense<0.000000e+00> : vector<8x256xf32>
    %29 = tpu.matmul %27, %28, %cst_12 {dimension_numbers = #tpu.dot_dimension_numbers<[1], [0], [0], [1], [0, 0, 1, 1], [], []>} : vector<8x8xf32>, vector<8x256xf32>, vector<8x256xf32> -> vector<8x256xf32>
    %30 = arith.addf %25, %29 : vector<8x256xf32>
    %c6 = arith.constant 6 : index
    %c0_13 = arith.constant 0 : index
    %c0_14 = arith.constant 0 : index
    %31 = vector.load %arg3[%c6, %c0_13, %c0_14] : memref<9x8x8xf32, #tpu.memory_space<vmem>>, vector<1x8x8xf32>
    %32 = vector.shape_cast %31 : vector<1x8x8xf32> to vector<8x8xf32>
    %33 = vector.extract_strided_slice %1 {offsets = [0, 32], sizes = [8, 256], strides = [1, 1]} : vector<8x290xf32> to vector<8x256xf32>
    %cst_15 = arith.constant dense<0.000000e+00> : vector<8x256xf32>
    %34 = tpu.matmul %32, %33, %cst_15 {dimension_numbers = #tpu.dot_dimension_numbers<[1], [0], [0], [1], [0, 0, 1, 1], [], []>} : vector<8x8xf32>, vector<8x256xf32>, vector<8x256xf32> -> vector<8x256xf32>
    %35 = arith.addf %30, %34 : vector<8x256xf32>
    %c0_i32_16 = arith.constant 0 : i32
    %36 = vector.broadcast %c0_i32_16 : i32 to vector<8x256xi32>
    %37 = arith.cmpi eq, %18, %36 : vector<8x256xi32>
    %cst_17 = arith.constant 0.000000e+00 : f32
    %38 = vector.broadcast %cst_17 : f32 to vector<8x256xf32>
    %39 = arith.select %37, %38, %35 : vector<8x256xi1>, vector<8x256xf32>
    %40 = arith.addf %19, %39 : vector<8x256xf32>
    %cst_18 = arith.constant 0.000000e+00 : f32
    %41 = vector.broadcast %cst_18 : f32 to vector<8x256xf32>
    %c1 = arith.constant 1 : index
    %c0_19 = arith.constant 0 : index
    %c0_20 = arith.constant 0 : index
    %42 = vector.load %arg3[%c1, %c0_19, %c0_20] : memref<9x8x8xf32, #tpu.memory_space<vmem>>, vector<1x8x8xf32>
    %43 = vector.shape_cast %42 : vector<1x8x8xf32> to vector<8x8xf32>
    %44 = vector.extract_strided_slice %1 {offsets = [0, 1], sizes = [8, 256], strides = [1, 1]} : vector<8x290xf32> to vector<8x256xf32>
    %cst_21 = arith.constant dense<0.000000e+00> : vector<8x256xf32>
    %45 = tpu.matmul %43, %44, %cst_21 {dimension_numbers = #tpu.dot_dimension_numbers<[1], [0], [0], [1], [0, 0, 1, 1], [], []>} : vector<8x8xf32>, vector<8x256xf32>, vector<8x256xf32> -> vector<8x256xf32>
    %46 = arith.addf %41, %45 : vector<8x256xf32>
    %c4 = arith.constant 4 : index
    %c0_22 = arith.constant 0 : index
    %c0_23 = arith.constant 0 : index
    %47 = vector.load %arg3[%c4, %c0_22, %c0_23] : memref<9x8x8xf32, #tpu.memory_space<vmem>>, vector<1x8x8xf32>
    %48 = vector.shape_cast %47 : vector<1x8x8xf32> to vector<8x8xf32>
    %49 = vector.extract_strided_slice %1 {offsets = [0, 17], sizes = [8, 256], strides = [1, 1]} : vector<8x290xf32> to vector<8x256xf32>
    %cst_24 = arith.constant dense<0.000000e+00> : vector<8x256xf32>
    %50 = tpu.matmul %48, %49, %cst_24 {dimension_numbers = #tpu.dot_dimension_numbers<[1], [0], [0], [1], [0, 0, 1, 1], [], []>} : vector<8x8xf32>, vector<8x256xf32>, vector<8x256xf32> -> vector<8x256xf32>
    %51 = arith.addf %46, %50 : vector<8x256xf32>
    %c7 = arith.constant 7 : index
    %c0_25 = arith.constant 0 : index
    %c0_26 = arith.constant 0 : index
    %52 = vector.load %arg3[%c7, %c0_25, %c0_26] : memref<9x8x8xf32, #tpu.memory_space<vmem>>, vector<1x8x8xf32>
    %53 = vector.shape_cast %52 : vector<1x8x8xf32> to vector<8x8xf32>
    %54 = vector.extract_strided_slice %1 {offsets = [0, 33], sizes = [8, 256], strides = [1, 1]} : vector<8x290xf32> to vector<8x256xf32>
    %cst_27 = arith.constant dense<0.000000e+00> : vector<8x256xf32>
    %55 = tpu.matmul %53, %54, %cst_27 {dimension_numbers = #tpu.dot_dimension_numbers<[1], [0], [0], [1], [0, 0, 1, 1], [], []>} : vector<8x8xf32>, vector<8x256xf32>, vector<8x256xf32> -> vector<8x256xf32>
    %56 = arith.addf %51, %55 : vector<8x256xf32>
    %57 = arith.addf %40, %56 : vector<8x256xf32>
    %cst_28 = arith.constant 0.000000e+00 : f32
    %58 = vector.broadcast %cst_28 : f32 to vector<8x256xf32>
    %c2 = arith.constant 2 : index
    %c0_29 = arith.constant 0 : index
    %c0_30 = arith.constant 0 : index
    %59 = vector.load %arg3[%c2, %c0_29, %c0_30] : memref<9x8x8xf32, #tpu.memory_space<vmem>>, vector<1x8x8xf32>
    %60 = vector.shape_cast %59 : vector<1x8x8xf32> to vector<8x8xf32>
    %61 = vector.extract_strided_slice %1 {offsets = [0, 2], sizes = [8, 256], strides = [1, 1]} : vector<8x290xf32> to vector<8x256xf32>
    %cst_31 = arith.constant dense<0.000000e+00> : vector<8x256xf32>
    %62 = tpu.matmul %60, %61, %cst_31 {dimension_numbers = #tpu.dot_dimension_numbers<[1], [0], [0], [1], [0, 0, 1, 1], [], []>} : vector<8x8xf32>, vector<8x256xf32>, vector<8x256xf32> -> vector<8x256xf32>
    %63 = arith.addf %58, %62 : vector<8x256xf32>
    %c5 = arith.constant 5 : index
    %c0_32 = arith.constant 0 : index
    %c0_33 = arith.constant 0 : index
    %64 = vector.load %arg3[%c5, %c0_32, %c0_33] : memref<9x8x8xf32, #tpu.memory_space<vmem>>, vector<1x8x8xf32>
    %65 = vector.shape_cast %64 : vector<1x8x8xf32> to vector<8x8xf32>
    %66 = vector.extract_strided_slice %1 {offsets = [0, 18], sizes = [8, 256], strides = [1, 1]} : vector<8x290xf32> to vector<8x256xf32>
    %cst_34 = arith.constant dense<0.000000e+00> : vector<8x256xf32>
    %67 = tpu.matmul %65, %66, %cst_34 {dimension_numbers = #tpu.dot_dimension_numbers<[1], [0], [0], [1], [0, 0, 1, 1], [], []>} : vector<8x8xf32>, vector<8x256xf32>, vector<8x256xf32> -> vector<8x256xf32>
    %68 = arith.addf %63, %67 : vector<8x256xf32>
    %c8 = arith.constant 8 : index
    %c0_35 = arith.constant 0 : index
    %c0_36 = arith.constant 0 : index
    %69 = vector.load %arg3[%c8, %c0_35, %c0_36] : memref<9x8x8xf32, #tpu.memory_space<vmem>>, vector<1x8x8xf32>
    %70 = vector.shape_cast %69 : vector<1x8x8xf32> to vector<8x8xf32>
    %71 = vector.extract_strided_slice %1 {offsets = [0, 34], sizes = [8, 256], strides = [1, 1]} : vector<8x290xf32> to vector<8x256xf32>
    %cst_37 = arith.constant dense<0.000000e+00> : vector<8x256xf32>
    %72 = tpu.matmul %70, %71, %cst_37 {dimension_numbers = #tpu.dot_dimension_numbers<[1], [0], [0], [1], [0, 0, 1, 1], [], []>} : vector<8x8xf32>, vector<8x256xf32>, vector<8x256xf32> -> vector<8x256xf32>
    %73 = arith.addf %68, %72 : vector<8x256xf32>
    %c15_i32 = arith.constant 15 : i32
    %74 = vector.broadcast %c15_i32 : i32 to vector<8x256xi32>
    %75 = arith.cmpi eq, %18, %74 : vector<8x256xi32>
    %cst_38 = arith.constant 0.000000e+00 : f32
    %76 = vector.broadcast %cst_38 : f32 to vector<8x256xf32>
    %77 = arith.select %75, %76, %73 : vector<8x256xi1>, vector<8x256xf32>
    %78 = arith.addf %57, %77 : vector<8x256xf32>
    %c0_39 = arith.constant 0 : index
    %c0_40 = arith.constant 0 : index
    %c0_41 = arith.constant 0 : index
    %79 = vector.load %arg4[%c0_39, %c0_40, %c0_41] : memref<1x8x256xf32, #tpu.memory_space<vmem>>, vector<1x8x256xf32>
    %80 = vector.shape_cast %79 : vector<1x8x256xf32> to vector<8x256xf32>
    %81 = vector.shape_cast %78 : vector<8x256xf32> to vector<1x8x256xf32>
    tpu.vector_store %arg4[%c0_39, %c0_40, %c0_41], %81 {strides = array<i32>} : memref<1x8x256xf32, #tpu.memory_space<vmem>>, vector<1x8x256xf32>,
    %c0_i32_42 = arith.constant 0 : i32
    %82 = arith.cmpi eq, %arg1, %c0_i32_42 : i32
    %83 = arith.extui %82 : i1 to i32
    %c0_i32_43 = arith.constant 0 : i32
    %84 = arith.cmpi ne, %83, %c0_i32_43 : i32
    scf.if %84 {
      %cst_58 = arith.constant 0.000000e+00 : f32
      %102 = vector.broadcast %cst_58 : f32 to vector<1x8x1xf32>
      %c0_59 = arith.constant 0 : index
      %c0_60 = arith.constant 0 : index
      %c0_61 = arith.constant 0 : index
      %103 = vector.load %arg5[%c0_59, %c0_60, %c0_61] : memref<1x8x1xf32, #tpu.memory_space<vmem>>, vector<1x8x1xf32>
      tpu.vector_store %arg5[%c0_59, %c0_60, %c0_61], %102 {strides = array<i32>} : memref<1x8x1xf32, #tpu.memory_space<vmem>>, vector<1x8x1xf32>,
      %cst_62 = arith.constant 0.000000e+00 : f32
      %104 = vector.broadcast %cst_62 : f32 to vector<1x8x1xf32>
      %c0_63 = arith.constant 0 : index
      %c0_64 = arith.constant 0 : index
      %c0_65 = arith.constant 0 : index
      %105 = vector.load %arg6[%c0_63, %c0_64, %c0_65] : memref<1x8x1xf32, #tpu.memory_space<vmem>>, vector<1x8x1xf32>
      tpu.vector_store %arg6[%c0_63, %c0_64, %c0_65], %104 {strides = array<i32>} : memref<1x8x1xf32, #tpu.memory_space<vmem>>, vector<1x8x1xf32>,
    } else {
    }
    %c0_44 = arith.constant 0 : index
    %c0_45 = arith.constant 0 : index
    %c0_46 = arith.constant 0 : index
    %85 = vector.load %arg5[%c0_44, %c0_45, %c0_46] : memref<1x8x1xf32, #tpu.memory_space<vmem>>, vector<1x8x1xf32>
    %86 = vector.shape_cast %85 : vector<1x8x1xf32> to vector<8x1xf32>
    %cst_47 = arith.constant dense<0.000000e+00> : vector<8xf32>
    %87 = vector.multi_reduction <add>, %78, %cst_47 [1] : vector<8x256xf32> to vector<8xf32>
    %88 = vector.shape_cast %87 : vector<8xf32> to vector<8x1xf32>
    %89 = arith.addf %86, %88 : vector<8x1xf32>
    %c0_48 = arith.constant 0 : index
    %c0_49 = arith.constant 0 : index
    %c0_50 = arith.constant 0 : index
    %90 = vector.load %arg5[%c0_48, %c0_49, %c0_50] : memref<1x8x1xf32, #tpu.memory_space<vmem>>, vector<1x8x1xf32>
    %91 = vector.shape_cast %90 : vector<1x8x1xf32> to vector<8x1xf32>
    %92 = vector.shape_cast %89 : vector<8x1xf32> to vector<1x8x1xf32>
    tpu.vector_store %arg5[%c0_48, %c0_49, %c0_50], %92 {strides = array<i32>} : memref<1x8x1xf32, #tpu.memory_space<vmem>>, vector<1x8x1xf32>,
    %c0_51 = arith.constant 0 : index
    %c0_52 = arith.constant 0 : index
    %c0_53 = arith.constant 0 : index
    %93 = vector.load %arg6[%c0_51, %c0_52, %c0_53] : memref<1x8x1xf32, #tpu.memory_space<vmem>>, vector<1x8x1xf32>
    %94 = vector.shape_cast %93 : vector<1x8x1xf32> to vector<8x1xf32>
    %95 = arith.mulf %78, %78 : vector<8x256xf32>
    %cst_54 = arith.constant dense<0.000000e+00> : vector<8xf32>
    %96 = vector.multi_reduction <add>, %95, %cst_54 [1] : vector<8x256xf32> to vector<8xf32>
    %97 = vector.shape_cast %96 : vector<8xf32> to vector<8x1xf32>
    %98 = arith.addf %94, %97 : vector<8x1xf32>
    %c0_55 = arith.constant 0 : index
    %c0_56 = arith.constant 0 : index
    %c0_57 = arith.constant 0 : index
    %99 = vector.load %arg6[%c0_55, %c0_56, %c0_57] : memref<1x8x1xf32, #tpu.memory_space<vmem>>, vector<1x8x1xf32>
    %100 = vector.shape_cast %99 : vector<1x8x1xf32> to vector<8x1xf32>
    %101 = vector.shape_cast %98 : vector<8x1xf32> to vector<1x8x1xf32>
    tpu.vector_store %arg6[%c0_55, %c0_56, %c0_57], %101 {strides = array<i32>} : memref<1x8x1xf32, #tpu.memory_space<vmem>>, vector<1x8x1xf32>,
    return
  }
  func.func @transform_0(%arg0: i32, %arg1: i32) -> (i32, i32, i32) {
    %c1_i32 = arith.constant 1 : i32
    %0 = arith.muli %arg0, %c1_i32 : i32
    %1 = arith.addi %0, %arg1 : i32
    %c0_i32 = arith.constant 0 : i32
    %c0_i32_0 = arith.constant 0 : i32
    %c0_i32_1 = arith.constant 0 : i32
    return %1, %c0_i32, %c0_i32_0 : i32, i32, i32
  }
  func.func @transform_1(%arg0: i32, %arg1: i32) -> (i32, i32, i32) {
    %c0_i32 = arith.constant 0 : i32
    %c0_i32_0 = arith.constant 0 : i32
    %c0_i32_1 = arith.constant 0 : i32
    %c0_i32_2 = arith.constant 0 : i32
    return %c0_i32, %c0_i32_0, %c0_i32_1 : i32, i32, i32
  }
  func.func @transform_2(%arg0: i32, %arg1: i32) -> (i32, i32, i32) {
    %c1_i32 = arith.constant 1 : i32
    %0 = arith.muli %arg0, %c1_i32 : i32
    %1 = arith.addi %0, %arg1 : i32
    %c0_i32 = arith.constant 0 : i32
    %c0_i32_0 = arith.constant 0 : i32
    %c0_i32_1 = arith.constant 0 : i32
    return %1, %c0_i32, %c0_i32_0 : i32, i32, i32
  }
  func.func @transform_3(%arg0: i32, %arg1: i32) -> (i32, i32, i32) {
    %c0_i32 = arith.constant 0 : i32
    %c0_i32_0 = arith.constant 0 : i32
    %c0_i32_1 = arith.constant 0 : i32
    return %arg0, %c0_i32, %c0_i32_0 : i32, i32, i32
  }
  func.func @transform_4(%arg0: i32, %arg1: i32) -> (i32, i32, i32) {
    %c0_i32 = arith.constant 0 : i32
    %c0_i32_0 = arith.constant 0 : i32
    %c0_i32_1 = arith.constant 0 : i32
    return %arg0, %c0_i32, %c0_i32_0 : i32, i32, i32
  }
}

</mosaic_0001>

<bundles_post_ra>
// kernel: tpu_custom_call.1
= control target key start
LH: loop header
LB: loop body
LE: loop exit
PB: predicated region body
PF: predicated region fallthrough
CT: control target
= control target key end

     0   :  { %10 = vsyncpa [#allocation3], 0  ;;  %s1639_s0 = inlined_call_operand.vmem [shape: f32[2,8,290], index: 0, kind: input, shape index: {}]   ;;  %s1640_s1 = inlined_call_operand.vmem [shape: f32[9,8,8], index: 1, kind: input, shape index: {}]   ;;  %s1641_s2 = inlined_call_operand.hbm [shape: f32[2,8,256], index: 2, kind: output, shape index: {0}]   ;;  %s1642_s3 = inlined_call_operand.vmem [shape: f32[2,8,1], index: 3, kind: output, shape index: {1}]   ;;  %s1643_s4 = inlined_call_operand.vmem [shape: f32[2,8,1], index: 4, kind: output, shape index: {2}]  }
   0x1   :  { %12 = vsyncpa [#allocation3 + $0x1], 0  ;;  %s1458_s15 = smov 0   ;;  %s1460_s16 = smov 0  }
   0x2   :  { %s1462_s17 = smov 0   ;;  %s1464_s18 = smov 0  }
   0x3   :  { %s1466_s19 = smov 0   ;;  %s1468_s20 = smov 0  }
   0x4 LB: > { %s1234_s21 = sadd.s32 4294967295, %s1421_s20   ;;  %s1235_s22 = sadd.s32 4294967294, %s1421_s20   ;;  %s1421_s20 = sphi %s1468_s20, %s18_s20   ;;  %s1417_s19 = sphi %s1466_s19, %s1650_s19   ;;  %s1413_s18 = sphi %s1464_s18, %s1649_s18   ;;  %s1409_s17 = sphi %s1462_s17, %s1648_s17   ;;  %s1405_s16 = sphi %s1460_s16, %s1647_s16   ;;  %s1401_s15 = sphi %s1458_s15, %s1646_s15  }
   0x5   : > { %s30_s23 = sadd.s32 1, %s1417_s19  ;;  %s88_s24 = sadd.s32 1, %s1409_s17 }
   0x6   : > { %p32_p0 = scmp.ge.s32.totalorder %s30_s23, 2  ;;  %p98_p1 = scmp.ne.s32.totalorder %s1409_s17, %s1405_s16 }
   0x7   : > { %p99_p2 = scmp.eq.s32.totalorder %s1234_s21, 1  ;;  %p104_p3 = scmp.ne.s32.totalorder %s1405_s16, %s1401_s15 }
   0x8   : > { %s1652_s23 = smov (%p32_p0, %s30_s23), 0  ;;  %p105_p5 = scmp.eq.s32.totalorder %s1235_s22, 1 }
   0x9   : > { %p1498_p4 = por %p99_p2, %p98_p1  ;;  %s85_s26 = ssub.s32 %s1417_s19, %s1652_s23 }
   0xa   : > { %p1238_p6 = scmp.ge.s32.totalorder %s1421_s20, 1  ;;  %p86_p7 = scmp.eq.s32.totalorder %s85_s26, 0 }
   0xb   : > { %p1505_p8 = por %p105_p5, %p104_p3  ;;  %p188_p9 = scmp.lt.s32.totalorder %s1421_s20, 3 }
   0xc   : > { %s1511_s28 = scalar_select %p86_p7, %s1409_s17, %s88_s24  }
   0xd   : > { %p189_p10 = pnand %p1238_p6, %p188_p9 }
   0xe   : > { %p224_p11 = scmp.lt.s32.totalorder (!%p189_p10), %s1413_s18, 1  ;;  %v1423_v0 = vmov (!%p189_p10), 0.0   ;;  %s1424_s8 = smov (!%p189_p10), 112   ;;  %v269_v3 = vld [vmem:[%s1640_s1] sm:$0xff] (!%p189_p10)  ;;  %vm286_vm0 = vcmask (!%p189_p10), 64512   ;;  %vm281_vm1 = vcmask (!%p189_p10), 916480   ;;  %v242_v59 = vlaneseq (!%p189_p10) }
   0xf   : > { %192 = sbr.rel (%p189_p10) target bundleno = 555 (0x22b), region = 28  ;;  %428 = vmatprep.mubr.f32.mxu0 (!%p189_p10), %v1423_v0  ;;  %354 = vmatprep.mubr.f32.mxu1 (!%p189_p10), %v1423_v0  ;;  %s1425_s11 = smov (!%p189_p10), 96   ;;  %v1243_v10 = vld [vmem:[%s1640_s1 + $0x18] sm:$0xff] (!%p189_p10)  ;;  %vm443_vm2 = vcmask (!%p189_p10), 785408   ;;  %v1246_v16 = vld [vmem:[%s1640_s1 + $0x30] sm:$0xff] (!%p189_p10)  ;;  %vm540_vm3 = vcmask (!%p189_p10), 908288  }
  0x10   : > { %s1426_s12 = smov (!%p189_p10), 111   ;;  %s1427_s13 = smov (!%p189_p10), 110   ;;  %v1249_v22 = vld [vmem:[%s1640_s1 + $0x20] sm:$0xff] (!%p189_p10)  ;;  %vm805_vm4 = vcmask (!%p189_p10), 900096   ;;  %v1255_v28 = vld [vmem:[%s1640_s1 + $0x28] sm:$0xff] (!%p189_p10)  ;;  %vm625_vm5 = vcmask (!%p189_p10), 1039360  }
  0x11   : > { %s1428_s14 = smov (!%p189_p10), 127   ;;  %s1429_s21 = smov (!%p189_p10), 126   ;;  %v1248_v34 = vld [vmem:[%s1640_s1 + $0x8] sm:$0xff] (!%p189_p10)  ;;  %vm890_vm6 = vcmask (!%p189_p10), 1031168   ;;  %v1254_v40 = vld [vmem:[%s1640_s1 + $0x10] sm:$0xff] (!%p189_p10)  ;;  %vm712_vm7 = vcmask (!%p189_p10), 777216  }
  0x12   : > { %s1430_s22 = smov (!%p189_p10), 95   ;;  %s1431_s24 = smov (!%p189_p10), 94   ;;  %v1252_v46 = vld [vmem:[%s1640_s1 + $0x38] sm:$0xff] (!%p189_p10)  ;;  %vm977_vm8 = vcmask (!%p189_p10), 769024   ;;  %v1258_v52 = vld [vmem:[%s1640_s1 + $0x40] sm:$0xff] (!%p189_p10)  ;;  %vm1070_vm9 = vcmask (!%p189_p10), 7168  }
  0x13   : > { %v243_v60 = vand.u32 (!%p189_p10), 127, %v242_v59 }
  0x15   : > { %v244_v61 = vadd.s32 (!%p189_p10), 128, %v243_v60  ;;  %v249_v62 = vand.u32 (!%p189_p10), 15, %v243_v60 }
  0x16   : > { %s1515_s29 = scalar_select %p224_p11, %s1413_s18, 1 }
  0x17   : > { %v256_v63 = vand.u32 15, %v244_v61  ;;  %vm524_vm10 = vcmp.eq.s32.totalorder %v249_v62, 0  ;;  %vm1058_vm12 = vcmp.eq.s32.totalorder %v249_v62, 15 }
  0x18   : > { %s1278_s30 = smul.u32 24, %s1515_s29 }
  0x19   : > { %vm525_vm11 = vcmp.eq.s32.totalorder %v256_v63, 0  ;;  %vm1059_vm13 = vcmp.eq.s32.totalorder %v256_v63, 15 }
  0x1a   : > { %s228_s7 = scalar_lea.vmem %s1639_s0, %s1278_s30  ;;  %s1241_s30 = sshll.u32 %s1515_s29, 3 }
  0x1b   : > { %v240_v1 = vld [vmem:[%s228_s7 + $0x8] sm:$0xff]  ;;  %v239_v2 = vld [vmem:[%s228_s7] sm:$0xff]  ;;  %v241_v4 = vld [vmem:[%s228_s7 + $0x10] sm:$0xff]  ;;  %s1572_s7 = scalar_lea.vmem %s1642_s3, %s1241_s30  ;;  %s1432_s29 = smov [#allocation2]  }
  0x1c   : > { %277 = vrot.lane.b32.xlu0 %v240_v1, %s1424_s8  ;;  %275 = vrot.lane.b32.xlu1 %v239_v2, %s1424_s8  ;;  %1071 = vst.msk [vmem:[%s1572_s7] sm:$0xff] %vm1070_vm9, %v1423_v0 }
  0x1d   : > { %364 = vmatprep.subr.mxu0 %v240_v1 }
  0x1e   : > { %365 = vmatpush1.msra.mxu0 %v239_v2 }
  0x1f   : > { %1245 = vmatmul.mubr.msk.f32.vlgmr.msra.gmra.mrb[0].mxu0 %vm286_vm0, %v269_v3 }
  0x20   : > { %279 = vrot.lane.b32.xlu0 %v241_v4, %s1424_s8  ;;  %439 = vrot.lane.b32.xlu1 %v240_v1, %s1425_s11  ;;  %s208_s8 = sand.u32 1, %s1405_s16  }
  0x21   : > { %515 = vmatprep.mubr.f32.mxu0 %v1423_v0  ;;  %s1239_s9 = sshll.u32 %s208_s8, 4  ;;  %s1089_s5 = scalar_lea.sflag [#allocation3], %s208_s8 }
  0x22   : > { %s210_s10 = scalar_lea.vmem [#allocation2], %s1239_s9 }
  0x24   : > { %441 = vrot.lane.b32.xlu0 %v241_v4, %s1425_s11  ;;  %437 = vrot.lane.b32.xlu1 %v239_v2, %s1425_s11 }
  0x28   : > { %536 = vrot.lane.b32.xlu0 %v240_v1, %s1426_s12  ;;  %538 = vrot.lane.b32.xlu1 %v241_v4, %s1426_s12 }
  0x2c   : > { %534 = vrot.lane.b32.xlu0 %v239_v2, %s1426_s12  ;;  %801 = vrot.lane.b32.xlu1 %v240_v1, %s1427_s13 }
  0x30   : > { %803 = vrot.lane.b32.xlu0 %v241_v4, %s1427_s13  ;;  %799 = vrot.lane.b32.xlu1 %v239_v2, %s1427_s13  ;;  %s1583_s13 = scalar_lea.vmem %s1643_s4, %s1241_s30  ;;  %s1347_s30 = sshll.u32 %s1432_s29, 4  ;;  %s1348_s30 = int_to_ptr.vmem [resolvable:$false] %s1347_s30 }
  0x31   : > { %1072 = vst.msk [vmem:[%s1583_s13] sm:$0xff] %vm1070_vm9, %v1423_v0  ;;  %s1349_s9 = scalar_lea.vmem %s1348_s30, 512 }
  0x34   : > { %621 = vrot.lane.b32.xlu0 %v240_v1, %s1428_s14  ;;  %623 = vrot.lane.b32.xlu1 %v241_v4, %s1428_s14 }
  0x38   : > { %619 = vrot.lane.b32.xlu0 %v239_v2, %s1428_s14  ;;  %886 = vrot.lane.b32.xlu1 %v240_v1, %s1429_s21  ;;  %s1265_s14 = sshll.u32 %s1413_s18, 8 }
  0x39   : > { %s1592_s26 = scalar_lea.hbm %s1641_s2, %s1265_s14 }
  0x3c   : > { %888 = vrot.lane.b32.xlu0 %v241_v4, %s1429_s21  ;;  %884 = vrot.lane.b32.xlu1 %v239_v2, %s1429_s21  ;;  %s1112_s21 = sshll.u32 %s210_s10, 4  ;;  %s1113_s21 = int_to_ptr.vmem [resolvable:$true] %s1112_s21 }
  0x3d   : > { %s1343_s6 = scalar_lea.vmem %s1113_s21, 256  ;;  %p1350_p1 = scmp.lt.s32.totalorder %s1113_s21, %s1348_s30 }
  0x3e   : > { %p1344_p12 = scmp.ne.s32.totalorder %s1113_s21, %s1343_s6  ;;  %p1351_p2 = scmp.lt.s32.totalorder %s1349_s9, %s1343_s6 }
  0x40   : > { %708 = vrot.lane.b32.xlu0 %v240_v1, %s1430_s22  ;;  %710 = vrot.lane.b32.xlu1 %v241_v4, %s1430_s22  ;;  %p1345_p13 = pnand %p1344_p12, %p1498_p4  ;;  %p1352_p3 = por %p1351_p2, %p1350_p1 }
  0x42   : > { %p1346_p0 = pneg %p1345_p13 }
  0x44   : > { %706 = vrot.lane.b32.xlu0 %v239_v2, %s1430_s22  ;;  %973 = vrot.lane.b32.xlu1 %v240_v1, %s1431_s24  ;;  %p1353_p5 = pnand %p1352_p3, %p1346_p0 }
  0x48   : > { %975 = vrot.lane.b32.xlu0 %v241_v4, %s1431_s24  ;;  %971 = vrot.lane.b32.xlu1 %v239_v2, %s1431_s24 }
  0x8e   : > { %v278_v5 = vpop.permute.xlu0 %277  ;;  %v276_v6 = vpop.permute.xlu1 %275 }
  0x8f   : > { %v282_v11 = vsel %vm281_vm1, %v276_v6, %v278_v5 }
  0x92   : > { %v280_v7 = vpop.permute.xlu0 %279  ;;  %v440_v8 = vpop.permute.xlu1 %439 }
  0x93   : > { %v283_v9 = vsel %vm281_vm1, %v278_v5, %v280_v7 }
  0x94   : > { %290 = vmatprep.subr.mxu1 %v283_v9 }
  0x95   : > { %291 = vmatpush1.msra.mxu1 %v282_v11 }
  0x96   : > { %v442_v12 = vpop.permute.xlu0 %441  ;;  %v438_v13 = vpop.permute.xlu1 %437  ;;  %1244 = vmatmul.mubr.msk.f32.vlgmr.msra.gmra.mrb[0].mxu1 %vm286_vm0, %v1243_v10 }
  0x97   : > { %v444_v14 = vsel %vm443_vm2, %v438_v13, %v440_v8  ;;  %v445_v15 = vsel %vm443_vm2, %v440_v8, %v442_v12  ;;  %612 = vmatprep.mubr.f32.mxu1 %v1423_v0 }
  0x98   : > { %451 = vmatprep.subr.mxu0 %v445_v15 }
  0x99   : > { %452 = vmatpush1.msra.mxu0 %v444_v14 }
  0x9a   : > { %v537_v17 = vpop.permute.xlu0 %536  ;;  %v539_v18 = vpop.permute.xlu1 %538  ;;  %1247 = vmatmul.mubr.msk.f32.vlgmr.msra.gmra.mrb[0].mxu0 %vm286_vm0, %v1246_v16 }
  0x9b   : > { %v542_v19 = vsel %vm540_vm3, %v537_v17, %v539_v18  ;;  %877 = vmatprep.mubr.f32.mxu0 %v1423_v0 }
  0x9c   : > { %548 = vmatprep.subr.mxu1 %v542_v19 }
  0x9e   : > { %v535_v20 = vpop.permute.xlu0 %534  ;;  %v802_v21 = vpop.permute.xlu1 %801 }
  0x9f   : > { %v541_v23 = vsel %vm540_vm3, %v535_v20, %v537_v17 }
  0xa0   : > { %549 = vmatpush1.msra.mxu1 %v541_v23 }
  0xa1   : > { %1250 = vmatmul.mubr.msk.f32.vlgmr.msra.gmra.mrb[2].mxu1 %vm286_vm0, %v1249_v22 }
  0xa2   : > { %v804_v24 = vpop.permute.xlu0 %803  ;;  %v800_v25 = vpop.permute.xlu1 %799  ;;  %697 = vmatprep.mubr.f32.mxu1 %v1423_v0 }
  0xa3   : > { %v806_v26 = vsel %vm805_vm4, %v800_v25, %v802_v21  ;;  %v807_v27 = vsel %vm805_vm4, %v802_v21, %v804_v24 }
  0xa4   : > { %813 = vmatprep.subr.mxu0 %v807_v27 }
  0xa5   : > { %814 = vmatpush1.msra.mxu0 %v806_v26 }
  0xa6   : > { %v622_v29 = vpop.permute.xlu0 %621  ;;  %v624_v30 = vpop.permute.xlu1 %623  ;;  %1256 = vmatmul.mubr.msk.f32.vlgmr.msra.gmra.mrb[2].mxu0 %vm286_vm0, %v1255_v28 }
  0xa7   : > { %v627_v31 = vsel %vm625_vm5, %v622_v29, %v624_v30  ;;  %962 = vmatprep.mubr.f32.mxu0 %v1423_v0 }
  0xa8   : > { %633 = vmatprep.subr.mxu1 %v627_v31 }
  0xaa   : > { %v620_v32 = vpop.permute.xlu0 %619  ;;  %v887_v33 = vpop.permute.xlu1 %886 }
  0xab   : > { %v626_v35 = vsel %vm625_vm5, %v620_v32, %v622_v29 }
  0xac   : > { %634 = vmatpush1.msra.mxu1 %v626_v35 }
  0xad   : > { %1251 = vmatmul.mubr.msk.f32.vlgmr.msra.gmra.mrb[2].mxu1 %vm286_vm0, %v1248_v34 }
  0xae   : > { %v889_v36 = vpop.permute.xlu0 %888  ;;  %v885_v37 = vpop.permute.xlu1 %884  ;;  %784 = vmatprep.mubr.f32.mxu1 %v1423_v0 }
  0xaf   : > { %v891_v38 = vsel %vm890_vm6, %v885_v37, %v887_v33  ;;  %v892_v39 = vsel %vm890_vm6, %v887_v33, %v889_v36 }
  0xb0   : > { %898 = vmatprep.subr.mxu0 %v892_v39 }
  0xb1   : > { %899 = vmatpush1.msra.mxu0 %v891_v38 }
  0xb2   : > { %v709_v41 = vpop.permute.xlu0 %708  ;;  %v711_v42 = vpop.permute.xlu1 %710  ;;  %1257 = vmatmul.mubr.msk.f32.vlgmr.msra.gmra.mrb[2].mxu0 %vm286_vm0, %v1254_v40 }
  0xb3   : > { %v714_v43 = vsel %vm712_vm7, %v709_v41, %v711_v42  ;;  %1049 = vmatprep.mubr.f32.mxu0 %v1423_v0 }
  0xb4   : > { %720 = vmatprep.subr.mxu1 %v714_v43 }
  0xb6   : > { %v707_v44 = vpop.permute.xlu0 %706  ;;  %v974_v45 = vpop.permute.xlu1 %973 }
  0xb7   : > { %v713_v47 = vsel %vm712_vm7, %v707_v44, %v709_v41 }
  0xb8   : > { %721 = vmatpush1.msra.mxu1 %v713_v47 }
  0xb9   : > { %1253 = vmatmul.mubr.msk.f32.vlgmr.msra.gmra.mrb[2].mxu1 %vm286_vm0, %v1252_v46 }
  0xba   : > { %v976_v48 = vpop.permute.xlu0 %975  ;;  %v972_v49 = vpop.permute.xlu1 %971 }
  0xbb   : > { %v978_v50 = vsel %vm977_vm8, %v972_v49, %v974_v45  ;;  %v979_v51 = vsel %vm977_vm8, %v974_v45, %v976_v48 }
  0xbc   : > { %985 = vmatprep.subr.mxu0 %v979_v51 }
  0xbd   : > { %986 = vmatpush1.msra.mxu0 %v978_v50 }
  0xbe   : > { %1259 = vmatmul.mubr.msk.f32.vlgmr.msra.gmra.mrb[2].mxu0 %vm286_vm0, %v1258_v52 }
 0x169   : > { %v356_v53 = vpop.f32.mrb[0].mxu1 }
 0x16a   : > { %v358_v54 = vpop.f32.mrb[1].mxu1 }
 0x16d   : > { %v517_v55 = vpop.f32.mrb[0].mxu0 }
 0x16e   : > { %v1266_v56 = vadd.f32 %v517_v55, %v356_v53  ;;  %v519_v57 = vpop.f32.mrb[1].mxu0 }
 0x16f   : > { %v1267_v58 = vadd.f32 %v519_v57, %v358_v54 }
 0x170   : > { %v526_v1 = vsel %vm524_vm10, 0.0, %v1266_v56 }
 0x171   : > { %v527_v4 = vsel %vm525_vm11, 0.0, %v1267_v58 }
 0x18c   : > { %v786_v2 = vpop.f32.mrb[2].mxu1 }
 0x18d   : > { %v793_v3 = vadd.f32 %v786_v2, %v526_v1  ;;  %v788_v5 = vpop.f32.mrb[3].mxu1 }
 0x18e   : > { %v794_v6 = vadd.f32 %v788_v5, %v527_v4 }
 0x191   : > { %v1051_v7 = vpop.f32.mrb[2].mxu0 }
 0x192   : > { %v1060_v8 = vsel %vm1058_vm12, 0.0, %v1051_v7  ;;  %v1053_v9 = vpop.f32.mrb[3].mxu0 }
 0x193   : > { %v1062_v10 = vadd.f32 %v1060_v8, %v793_v3  ;;  %v1061_v11 = vsel %vm1059_vm13, 0.0, %v1053_v9 }
 0x194   : > { %v1063_v12 = vadd.f32 %v1061_v11, %v794_v6 }
 0x195   : > { %v1081_v13 = vmul.f32 %v1062_v10, %v1062_v10  ;;  %1064 = vst [vmem:[%s210_s10] sm:$0xff] %v1062_v10 }
 0x196   : > { %v1074_v14 = vadd.f32 %v1063_v12, %v1062_v10  ;;  %v1082_v15 = vmul.f32 %v1063_v12, %v1063_v12  ;;  %1065 = vst [vmem:[%s210_s10 + $0x8] sm:$0xff] %v1063_v12 }
 0x198   : > { %1075 = vadd.xlane.f32.xlu0 %v1074_v14  ;;  %v1083_v16 = vadd.f32 %v1082_v15, %v1081_v13 }
 0x19a   : > { %1084 = vadd.xlane.f32.xlu1 %v1083_v16 }
 0x19b   : > { %1356 = shalt.err (!%p1353_p5)
}
 0x19c   : > { %s1357_s18 = scalar_lea.hbm %s1592_s26, 256  ;;  %s1361_s11 = scalar_lea.hbm %s1641_s2, 512 }
 0x19d   : > { %p1358_p6 = scmp.ne.s32.totalorder %s1592_s26, %s1357_s18  ;;  %p1362_p10 = scmp.lt.u32.totalorder %s1592_s26, %s1641_s2 }
 0x19e   : > { %p1363_p11 = scmp.lt.u32.totalorder %s1361_s11, %s1357_s18  ;;  %p1365_p13 = scmp.lt.u32.totalorder %s1357_s18, %s1592_s26 }
 0x19f   : > { %p1359_p7 = pnand %p1358_p6, %p1498_p4 }
 0x1a0   : > { %p1364_p12 = por %p1363_p11, %p1362_p10 }
 0x1a1   : > { %p1360_p9 = pneg %p1359_p7 }
 0x1a2   : > { %p1366_p0 = por %p1365_p13, %p1364_p12 }
 0x1a4   : > { %p1367_p1 = pnand %p1366_p0, %p1360_p9 }
 0x1a6   : > { %1370 = shalt.err (!%p1367_p1)
}
 0x1a7   : > { %1279 = dma.vmem_to_hbm [thread:$0]  (%p1498_p4), %s1113_s21, 256, %s1592_s26, %s1089_s5   ;;  %v1073_v0 = vld [vmem:[%s1572_s7] sm:$0xff] }
 0x1a8   : > { %v1080_v18 = vld [vmem:[%s1583_s13] sm:$0xff] }
 0x225   : > { %v1076_v17 = vpop.xlane.xlu0 %1075 }
 0x226   : > { %v1077_v19 = vadd.f32 %v1076_v17, %v1073_v0 }
 0x227   : > { %v1085_v20 = vpop.xlane.xlu1 %1084 }
 0x228   : > { %1079 = vst.msk [vmem:[%s1572_s7] sm:$0xff] %vm1070_vm9, %v1077_v19  ;;  %v1086_v21 = vadd.f32 %v1085_v20, %v1080_v18 }
 0x22a   : > { %1087 = vst.msk [vmem:[%s1583_s13] sm:$0xff] %vm1070_vm9, %v1086_v21 }
 0x22b PF: > { %p1285_p2 = scmp.ge.s32.totalorder %s1421_s20, 2  ;;  %s1130_s25 = sand.u32 1, %s1401_s15  }
 0x22c   : > { %s1131_s22 = scalar_lea.sflag [#allocation3], %s1130_s25 }
 0x22d   : > { %p1282_p3 = pnand %p1285_p2, %p1505_p8 }
 0x22f   : > { %1396 = dma.done.wait (!%p1282_p3), %s1131_s22, 256  }
 0x230   : > { %1398 = vsyncadd (!%p1282_p3), %s1131_s22, 4294967040  ;;  %s18_s20 = sadd.s32 1, %s1421_s20   ;;  %s1646_s15 = smov %s1405_s16 }
 0x231   : > { %p15_p4 = scmp.ge.s32.totalorder %s18_s20, 4   ;;  %s1647_s16 = smov %s1409_s17 }
 0x232   : > { %s1648_s17 = smov %s1511_s28  ;;  %s1649_s18 = smov %s1417_s19 }
 0x233   : > { %s1650_s19 = smov %s1652_s23  ;;  %17 = sbr.rel (!%p15_p4) target bundleno = 4 (0x4), region = 99 }
 0x23a   :  { %1150 = vsyncpa [#allocation3], 1 }
 0x23b   :  { %1152 = vsyncpa [#allocation3 + $0x1], 1 }

</bundles_post_ra>
